<compile_context>
chip_gen: v7x
topology: tpu7x:2x2x1
jax: 0.10.0
libtpu: 0.0.40
codegen_flags: <defaults>
</compile_context>

<pallas_src>
import jax
import jax.numpy as jnp
from jax.experimental import pallas as pl
from jax.experimental.pallas import tpu as pltpu

_LANES = 128


def _copy_kernel(x_ref, o_ref):
    # Straight VMEM -> VMEM copy of the current (lane-dense) tile.
    o_ref[...] = x_ref[...]


def _pick_tile_rows(rows):
    """Largest power-of-two tile (<=512 rows) that evenly divides `rows`."""
    for cand in (512, 256, 128, 64, 32, 16, 8):
        if rows % cand == 0:
            return cand
    # Fallback: full-extent block (always legal per the (8,128) rule).
    return rows


def _identity_copy_2d(x2d):
    rows, lanes = x2d.shape
    tile_rows = _pick_tile_rows(rows)
    grid_rows = rows // tile_rows
    return pl.pallas_call(
        _copy_kernel,
        out_shape=jax.ShapeDtypeStruct((rows, lanes), x2d.dtype),
        grid=(grid_rows,),
        in_specs=[pl.BlockSpec((tile_rows, lanes), lambda i: (i, 0))],
        out_specs=pl.BlockSpec((tile_rows, lanes), lambda i: (i, 0)),
        # Output aliases the input buffer: no second HBM allocation.
        input_output_aliases={0: 0},
        compiler_params=pltpu.CompilerParams(
            # Independent tiles -> megacore sharding on v7x (no-op on v5e/v6e).
            dimension_semantics=("parallel",),
        ),
    )(x2d)


def _identity_copy_full(x):
    # Fallback for shapes whose element count is not a multiple of 128 lanes:
    # single full-array block (still aliased, no extra HBM buffer).
    return pl.pallas_call(
        _copy_kernel,
        out_shape=jax.ShapeDtypeStruct(x.shape, x.dtype),
        input_output_aliases={0: 0},
    )(x)


@jax.jit
def dialation_layer_forward(x):
    """Pallas-backed stand-in for DialationLayer.forward (identity copy)."""
    total = x.size
    if total % _LANES == 0:
        x2d = x.reshape(total // _LANES, _LANES)  # lane-dense 2D slab
        y2d = _identity_copy_2d(x2d)
        return y2d.reshape(x.shape)
    return _identity_copy_full(x)


class DialationLayerJAX:
    """Mirror of the PyTorch DialationLayer: __init__(n_inputs) holds no params."""

    def __init__(self, n_inputs):
        self.n_inputs = n_inputs  # unused, as in the reference __init__

    def __call__(self, x):
        # Execute the Pallas kernel (device work), but match the PyTorch
        # module's semantics: forward() has no return statement -> None.
        dialation_layer_forward(x)
        return None


if __name__ == "__main__":
    key = jax.random.PRNGKey(0)
    # Small NCHW input consistent with a conv-style layer: batch=2, channels=4,
    # spatial 16x16.
    x = jax.random.normal(key, (2, 4, 16, 16), dtype=jnp.float32)

    # Module-style call: returns None, matching the PyTorch forward semantics.
    layer = DialationLayerJAX(n_inputs=4)
    result = layer(x)
    assert result is None

    # Run the kernel directly once and block on its output.
    y = dialation_layer_forward(x)
    jax.block_until_ready(y)

    # Correctness check kept out of the hot path (one-time, in the test main).
    assert bool(jnp.array_equal(y, x)), "identity kernel mismatch"
    print("KERNEL_OK")
</pallas_src>

<mosaic_0001>
module attributes {stable_mosaic.version = 11 : i64} {
  func.func @_copy_kernel(%arg0: i32, %arg1: memref<16x128xf32, #tpu.memory_space<vmem>>, %arg2: memref<16x128xf32, #tpu.memory_space<vmem>>) attributes {dimension_semantics = [#tpu.dimension_semantics<parallel>], iteration_bounds = array<i64: 1>, scalar_prefetch = 0 : i64, scratch_operands = 0 : i64, tpu.core_type = #tpu.core_type<tc>, window_params = [{transform_indices = @transform_0, window_bounds = array<i64: 16, 128>}, {transform_indices = @transform_1, window_bounds = array<i64: 16, 128>}]} {
    %c0 = arith.constant 0 : index
    %c0_0 = arith.constant 0 : index
    %0 = vector.load %arg1[%c0, %c0_0] : memref<16x128xf32, #tpu.memory_space<vmem>>, vector<16x128xf32>
    %c0_1 = arith.constant 0 : index
    %c0_2 = arith.constant 0 : index
    %1 = vector.load %arg2[%c0_1, %c0_2] : memref<16x128xf32, #tpu.memory_space<vmem>>, vector<16x128xf32>
    tpu.vector_store %arg2[%c0_1, %c0_2], %0 {strides = array<i32>} : memref<16x128xf32, #tpu.memory_space<vmem>>, vector<16x128xf32>,
    return
  }
  func.func @transform_0(%arg0: i32) -> (i32, i32) {
    %c0_i32 = arith.constant 0 : i32
    %c0_i32_0 = arith.constant 0 : i32
    return %arg0, %c0_i32 : i32, i32
  }
  func.func @transform_1(%arg0: i32) -> (i32, i32) {
    %c0_i32 = arith.constant 0 : i32
    %c0_i32_0 = arith.constant 0 : i32
    return %arg0, %c0_i32 : i32, i32
  }
}

</mosaic_0001>

<bundles_post_ra>
// kernel: dialation_layer_forward.1
= control target key start
LH: loop header
LB: loop body
LE: loop exit
PB: predicated region body
PF: predicated region fallthrough
CT: control target
= control target key end

     0   :  { %s38_s0 = inlined_call_operand.vmem [shape: f32[16,128], index: 0, kind: input, shape index: {}, may-alias: {0,1}]   ;;  %s39_s1 = inlined_call_operand.vmem [shape: f32[16,128], index: 1, kind: output, shape index: {}, may-alias: {0,1}]  }
   0x1   :  { %v8_v0 = vld [vmem:[%s38_s0] sm:$0xff]  ;;  %v9_v1 = vld [vmem:[%s38_s0 + $0x8] sm:$0xff] }
   0x2   :  { %10 = vst [vmem:[%s39_s1] sm:$0xff] %v8_v0  ;;  %11 = vst [vmem:[%s39_s1 + $0x8] sm:$0xff] %v9_v1 }

</bundles_post_ra>
